<compile_context>
chip_gen: v6e
topology: v6e:2x2x1
jax: 0.10.0
libtpu: 0.0.40
codegen_flags: <defaults>
</compile_context>

<pallas_src>
import jax
import jax.numpy as jnp
from jax import lax
from jax.experimental import pallas as pl
from jax.experimental.pallas import tpu as pltpu

LANE = 128      # lane width: hidden / gate axes padded to this
SUBLANE = 8     # sublane width: batch axis padded to this


def _gru_kernel(x2d_ref, h0_ref, wih_ref, whh_ref, gbias_ref, bhn_ref,
                out_ref, gi_ref):
    """Whole-sequence GRU.

    x2d_ref : (S*Bp, F)     bf16  flattened input, batch padded to 8 sublanes
    h0_ref  : (Bp, Hp)      f32   initial hidden (lane/sublane padded)
    wih_ref : (F, 3*Hp)     bf16  gate g lives at cols [g*Hp, g*Hp+H)
    whh_ref : (H, 3*Hp)     bf16  COMPACT contraction rows (no zero rows)
    gbias   : (1, 3*Hp)     f32   b_ih + (b_hr, b_hz, 0) folded in
    bhn_ref : (1, Hp)       f32   b_hn (must stay inside the recurrence)
    out_ref : (S, Bp, Hp)         per-step hidden states
    gi_ref  : (S, Bp, 3*Hp) f32   VMEM scratch: per-step input projections
    """
    S, Bp, Hp = out_ref.shape
    H = whh_ref.shape[0]

    # (1) Input projections for every timestep in ONE MXU matmul
    #     (bf16 operands, f32 accumulate) -- off the serial critical path.
    gi_all = (jnp.dot(x2d_ref[...], wih_ref[...],
                      preferred_element_type=jnp.float32)
              + gbias_ref[...])                            # (S*Bp, 3*Hp) f32
    gi_ref[...] = gi_all.reshape(S, Bp, 3 * Hp)            # tile-aligned split

    h = h0_ref[...]                                        # (Bp, Hp) f32
    bhn = jnp.broadcast_to(bhn_ref[...], (Bp, Hp))         # hoisted broadcast

    # (2) Serial time recurrence (S small & static -> unrolled).  whh and gi
    #     are read from VMEM every step, so nothing large stays live in vregs.
    for t in range(S):
        gi = gi_ref[t]                                     # (Bp, 3*Hp) aligned tile
        # Compact hidden matmul: contract only the H valid lanes of h against
        # the H-row weight (small MXU weight push per step), bf16 in, f32 out.
        gh = jnp.dot(h[:, :H].astype(jnp.bfloat16), whh_ref[...],
                     preferred_element_type=jnp.float32)   # (Bp, 3*Hp) f32
        # 128-lane-aligned gate slices.
        i_r, i_z, i_n = gi[:, :Hp], gi[:, Hp:2 * Hp], gi[:, 2 * Hp:]
        h_r, h_z = gh[:, :Hp], gh[:, Hp:2 * Hp]
        h_n = gh[:, 2 * Hp:] + bhn
        r = jax.nn.sigmoid(i_r + h_r)                      # f32 gate math
        z = jax.nn.sigmoid(i_z + h_z)
        n = jnp.tanh(i_n + r * h_n)
        h = n + z * (h - n)                                # == (1-z)*n + z*h
        out_ref[t] = h.astype(out_ref.dtype)               # dense (8,128) store


def prepare_gru_params(w_ih, w_hh, b_ih, b_hh):
    """One-off packing of torch.nn.GRU parameters for the Pallas kernel.

    Hoisted out of the forward so the padding / folding / bf16 casts run once
    (or constant-fold), not on every encoder invocation.
    w_ih: (3H, F); w_hh: (3H, H); b_ih, b_hh: (3H,).
    """
    H = w_hh.shape[1]
    Hp = max(LANE, ((H + LANE - 1) // LANE) * LANE)
    f32 = jnp.float32

    def pad_gate_cols(wt):  # (K, 3H) -> (K, 3Hp): gate g at cols [g*Hp, g*Hp+H)
        return jnp.concatenate(
            [jnp.pad(wt[:, g * H:(g + 1) * H], ((0, 0), (0, Hp - H)))
             for g in range(3)], axis=1)

    def pad_gate_vec(b):    # (3H,) -> (3Hp,)
        return jnp.concatenate(
            [jnp.pad(b[g * H:(g + 1) * H], (0, Hp - H)) for g in range(3)])

    wih_p = pad_gate_cols(w_ih.T.astype(f32)).astype(jnp.bfloat16)   # (F, 3Hp)
    # Compact hidden weight: keep only the H real contraction rows.
    whh_p = pad_gate_cols(w_hh.T.astype(f32)).astype(jnp.bfloat16)   # (H, 3Hp)

    b_ih = b_ih.astype(f32)
    b_hh = b_hh.astype(f32)
    # Fold b_ih fully and b_hr/b_hz into the batched input-projection bias;
    # only b_hn (which is multiplied by r) stays inside the recurrence.
    gbias = pad_gate_vec(
        jnp.concatenate([b_ih[:H] + b_hh[:H],
                         b_ih[H:2 * H] + b_hh[H:2 * H],
                         b_ih[2 * H:]])).reshape(1, 3 * Hp)           # f32
    bhn = jnp.pad(b_hh[2 * H:], (0, Hp - H)).reshape(1, Hp)           # f32
    return wih_p, whh_p, gbias, bhn


def gru_forward(x, h0, wih_p, whh_p, gbias, bhn):
    """x: (S, B, F); h0: (1, B, H); packed params from prepare_gru_params.

    Returns (output (S, B, H), hidden (1, B, H)) matching torch.nn.GRU.
    """
    S, B, F = x.shape
    H = whh_p.shape[0]
    Hp = bhn.shape[1]
    Bp = max(SUBLANE, ((B + SUBLANE - 1) // SUBLANE) * SUBLANE)

    # Sublane-pad the batch so every per-step tile / store is a full (8,128).
    x_p = jnp.pad(x, ((0, 0), (0, Bp - B), (0, 0))).astype(jnp.bfloat16)
    x2d = x_p.reshape(S * Bp, F)
    h0_p = jnp.pad(h0.reshape(B, H).astype(jnp.float32),
                   ((0, Bp - B), (0, Hp - H)))

    out_p = pl.pallas_call(
        _gru_kernel,
        out_shape=jax.ShapeDtypeStruct((S, Bp, Hp), x.dtype),
        in_specs=[pl.BlockSpec(memory_space=pltpu.MemorySpace.VMEM)] * 6,
        out_specs=pl.BlockSpec(memory_space=pltpu.MemorySpace.VMEM),
        scratch_shapes=[pltpu.VMEM((S, Bp, 3 * Hp), jnp.float32)],
    )(x2d, h0_p, wih_p, whh_p, gbias, bhn)

    out = out_p[:, :B, :H]        # strip sublane / lane padding
    hidden = out[-1][None]        # (1, B, H): last hidden == last output row
    return out, hidden


def gru_reference(x, h0, w_ih, w_hh, b_ih, b_hh):
    """Pure-JAX f32 reference (lax.scan) with PyTorch GRU equations."""
    H = w_hh.shape[1]

    def step(h, x_t):
        gi = x_t @ w_ih.T + b_ih
        gh = h @ w_hh.T + b_hh
        i_r, i_z, i_n = gi[:, :H], gi[:, H:2 * H], gi[:, 2 * H:]
        h_r, h_z, h_n = gh[:, :H], gh[:, H:2 * H], gh[:, 2 * H:]
        r = jax.nn.sigmoid(i_r + h_r)
        z = jax.nn.sigmoid(i_z + h_z)
        n = jnp.tanh(i_n + r * h_n)
        h_new = (1.0 - z) * n + z * h
        return h_new, h_new

    h_last, ys = lax.scan(step, h0.reshape(h0.shape[1], H), x)
    return ys, h_last[None]


if __name__ == "__main__":
    # Shapes implied by the module: seq=8, num_nodes(batch)=2,
    # num_features=4, hidden_channels=32.
    S, B, F, H = 8, 2, 4, 32
    key = jax.random.PRNGKey(0)
    k1, k2, k3, k4, k5 = jax.random.split(key, 5)

    bound = 1.0 / jnp.sqrt(H)
    w_ih = jax.random.uniform(k1, (3 * H, F), jnp.float32, -bound, bound)
    w_hh = jax.random.uniform(k2, (3 * H, H), jnp.float32, -bound, bound)
    b_ih = jax.random.uniform(k3, (3 * H,), jnp.float32, -bound, bound)
    b_hh = jax.random.uniform(k4, (3 * H,), jnp.float32, -bound, bound)

    x = jax.random.normal(k5, (S, B, F), jnp.float32)
    h0 = jnp.zeros((1, B, H), jnp.float32)   # RNNEncoder.init_hidden

    # One-off weight packing, hoisted out of the jitted forward.
    params = prepare_gru_params(w_ih, w_hh, b_ih, b_hh)

    fwd = jax.jit(gru_forward)
    out, h_last = fwd(x, h0, *params)
    jax.block_until_ready((out, h_last))

    out_ref, h_ref = gru_reference(x, h0, w_ih, w_hh, b_ih, b_hh)
    # bf16 MXU operands (f32 accumulation / f32 gate math) vs a pure-f32
    # reference -> tolerance is looser than the old all-f32 variant.
    assert jnp.allclose(out, out_ref, atol=5e-2, rtol=5e-2), "output mismatch"
    assert jnp.allclose(h_last, h_ref, atol=5e-2, rtol=5e-2), "hidden mismatch"

    print("KERNEL_OK")
</pallas_src>

<mosaic_0001>
module attributes {stable_mosaic.version = 11 : i64} {
  func.func @_gru_kernel(%arg0: memref<64x4xbf16, #tpu.memory_space<vmem>>, %arg1: memref<8x128xf32, #tpu.memory_space<vmem>>, %arg2: memref<4x384xbf16, #tpu.memory_space<vmem>>, %arg3: memref<32x384xbf16, #tpu.memory_space<vmem>>, %arg4: memref<1x384xf32, #tpu.memory_space<vmem>>, %arg5: memref<1x128xf32, #tpu.memory_space<vmem>>, %arg6: memref<8x8x128xf32, #tpu.memory_space<vmem>>, %arg7: memref<8x8x384xf32, #tpu.memory_space<vmem>>) attributes {dimension_semantics = [], scalar_prefetch = 0 : i64, scratch_operands = 1 : i64, tpu.core_type = #tpu.core_type<tc>} {
    %c0 = arith.constant 0 : index
    %c0_0 = arith.constant 0 : index
    %0 = vector.load %arg0[%c0, %c0_0] : memref<64x4xbf16, #tpu.memory_space<vmem>>, vector<64x4xbf16>
    %c0_1 = arith.constant 0 : index
    %c0_2 = arith.constant 0 : index
    %1 = vector.load %arg2[%c0_1, %c0_2] : memref<4x384xbf16, #tpu.memory_space<vmem>>, vector<4x384xbf16>
    %cst = arith.constant dense<0.000000e+00> : vector<64x384xf32>
    %2 = tpu.matmul %0, %1, %cst {dimension_numbers = #tpu.dot_dimension_numbers<[1], [0], [0], [1], [0, 0, 1, 1], [], []>} : vector<64x4xbf16>, vector<4x384xbf16>, vector<64x384xf32> -> vector<64x384xf32>
    %c0_3 = arith.constant 0 : index
    %c0_4 = arith.constant 0 : index
    %3 = vector.load %arg4[%c0_3, %c0_4] : memref<1x384xf32, #tpu.memory_space<vmem>>, vector<1x384xf32>
    %4 = vector.broadcast %3 : vector<1x384xf32> to vector<64x384xf32>
    %5 = arith.addf %2, %4 : vector<64x384xf32>
    %6 = vector.shape_cast %5 : vector<64x384xf32> to vector<8x8x384xf32>
    %c0_5 = arith.constant 0 : index
    %c0_6 = arith.constant 0 : index
    %c0_7 = arith.constant 0 : index
    %7 = vector.load %arg7[%c0_5, %c0_6, %c0_7] : memref<8x8x384xf32, #tpu.memory_space<vmem>>, vector<8x8x384xf32>
    tpu.vector_store %arg7[%c0_5, %c0_6, %c0_7], %6 {strides = array<i32>} : memref<8x8x384xf32, #tpu.memory_space<vmem>>, vector<8x8x384xf32>,
    %c0_8 = arith.constant 0 : index
    %c0_9 = arith.constant 0 : index
    %8 = vector.load %arg1[%c0_8, %c0_9] : memref<8x128xf32, #tpu.memory_space<vmem>>, vector<8x128xf32>
    %c0_10 = arith.constant 0 : index
    %c0_11 = arith.constant 0 : index
    %9 = vector.load %arg5[%c0_10, %c0_11] : memref<1x128xf32, #tpu.memory_space<vmem>>, vector<1x128xf32>
    %10 = vector.shape_cast %9 : vector<1x128xf32> to vector<1x128xf32>
    %11 = vector.broadcast %10 : vector<1x128xf32> to vector<8x128xf32>
    %c0_12 = arith.constant 0 : index
    %c0_13 = arith.constant 0 : index
    %c0_14 = arith.constant 0 : index
    %12 = vector.load %arg7[%c0_12, %c0_13, %c0_14] : memref<8x8x384xf32, #tpu.memory_space<vmem>>, vector<1x8x384xf32>
    %13 = vector.shape_cast %12 : vector<1x8x384xf32> to vector<8x384xf32>
    %14 = vector.extract_strided_slice %8 {offsets = [0, 0], sizes = [8, 32], strides = [1, 1]} : vector<8x128xf32> to vector<8x32xf32>
    %15 = arith.truncf %14 : vector<8x32xf32> to vector<8x32xbf16>
    %c0_15 = arith.constant 0 : index
    %c0_16 = arith.constant 0 : index
    %16 = vector.load %arg3[%c0_15, %c0_16] : memref<32x384xbf16, #tpu.memory_space<vmem>>, vector<32x384xbf16>
    %cst_17 = arith.constant dense<0.000000e+00> : vector<8x384xf32>
    %17 = tpu.matmul %15, %16, %cst_17 {dimension_numbers = #tpu.dot_dimension_numbers<[1], [0], [0], [1], [0, 0, 1, 1], [], []>} : vector<8x32xbf16>, vector<32x384xbf16>, vector<8x384xf32> -> vector<8x384xf32>
    %18 = vector.extract_strided_slice %13 {offsets = [0, 0], sizes = [8, 128], strides = [1, 1]} : vector<8x384xf32> to vector<8x128xf32>
    %19 = vector.extract_strided_slice %13 {offsets = [0, 128], sizes = [8, 128], strides = [1, 1]} : vector<8x384xf32> to vector<8x128xf32>
    %20 = vector.extract_strided_slice %13 {offsets = [0, 256], sizes = [8, 128], strides = [1, 1]} : vector<8x384xf32> to vector<8x128xf32>
    %21 = vector.extract_strided_slice %17 {offsets = [0, 0], sizes = [8, 128], strides = [1, 1]} : vector<8x384xf32> to vector<8x128xf32>
    %22 = vector.extract_strided_slice %17 {offsets = [0, 128], sizes = [8, 128], strides = [1, 1]} : vector<8x384xf32> to vector<8x128xf32>
    %23 = vector.extract_strided_slice %17 {offsets = [0, 256], sizes = [8, 128], strides = [1, 1]} : vector<8x384xf32> to vector<8x128xf32>
    %24 = arith.addf %23, %11 : vector<8x128xf32>
    %25 = arith.addf %18, %21 : vector<8x128xf32>
    %26 = arith.negf %25 : vector<8x128xf32>
    %27 = math.exp %26 : vector<8x128xf32>
    %cst_18 = arith.constant 1.000000e+00 : f32
    %28 = vector.broadcast %cst_18 : f32 to vector<8x128xf32>
    %29 = arith.addf %28, %27 : vector<8x128xf32>
    %30 = arith.divf %28, %29 : vector<8x128xf32>
    %31 = arith.addf %19, %22 : vector<8x128xf32>
    %32 = arith.negf %31 : vector<8x128xf32>
    %33 = math.exp %32 : vector<8x128xf32>
    %cst_19 = arith.constant 1.000000e+00 : f32
    %34 = vector.broadcast %cst_19 : f32 to vector<8x128xf32>
    %35 = arith.addf %34, %33 : vector<8x128xf32>
    %36 = arith.divf %34, %35 : vector<8x128xf32>
    %37 = arith.mulf %30, %24 : vector<8x128xf32>
    %38 = arith.addf %20, %37 : vector<8x128xf32>
    %39 = math.tanh %38 : vector<8x128xf32>
    %40 = arith.subf %8, %39 : vector<8x128xf32>
    %41 = arith.mulf %36, %40 : vector<8x128xf32>
    %42 = arith.addf %39, %41 : vector<8x128xf32>
    %c0_20 = arith.constant 0 : index
    %c0_21 = arith.constant 0 : index
    %c0_22 = arith.constant 0 : index
    %43 = vector.load %arg6[%c0_20, %c0_21, %c0_22] : memref<8x8x128xf32, #tpu.memory_space<vmem>>, vector<1x8x128xf32>
    %44 = vector.shape_cast %43 : vector<1x8x128xf32> to vector<8x128xf32>
    %45 = vector.shape_cast %42 : vector<8x128xf32> to vector<1x8x128xf32>
    tpu.vector_store %arg6[%c0_20, %c0_21, %c0_22], %45 {strides = array<i32>} : memref<8x8x128xf32, #tpu.memory_space<vmem>>, vector<1x8x128xf32>,
    %c1 = arith.constant 1 : index
    %c0_23 = arith.constant 0 : index
    %c0_24 = arith.constant 0 : index
    %46 = vector.load %arg7[%c1, %c0_23, %c0_24] : memref<8x8x384xf32, #tpu.memory_space<vmem>>, vector<1x8x384xf32>
    %47 = vector.shape_cast %46 : vector<1x8x384xf32> to vector<8x384xf32>
    %48 = vector.extract_strided_slice %42 {offsets = [0, 0], sizes = [8, 32], strides = [1, 1]} : vector<8x128xf32> to vector<8x32xf32>
    %49 = arith.truncf %48 : vector<8x32xf32> to vector<8x32xbf16>
    %c0_25 = arith.constant 0 : index
    %c0_26 = arith.constant 0 : index
    %50 = vector.load %arg3[%c0_25, %c0_26] : memref<32x384xbf16, #tpu.memory_space<vmem>>, vector<32x384xbf16>
    %cst_27 = arith.constant dense<0.000000e+00> : vector<8x384xf32>
    %51 = tpu.matmul %49, %50, %cst_27 {dimension_numbers = #tpu.dot_dimension_numbers<[1], [0], [0], [1], [0, 0, 1, 1], [], []>} : vector<8x32xbf16>, vector<32x384xbf16>, vector<8x384xf32> -> vector<8x384xf32>
    %52 = vector.extract_strided_slice %47 {offsets = [0, 0], sizes = [8, 128], strides = [1, 1]} : vector<8x384xf32> to vector<8x128xf32>
    %53 = vector.extract_strided_slice %47 {offsets = [0, 128], sizes = [8, 128], strides = [1, 1]} : vector<8x384xf32> to vector<8x128xf32>
    %54 = vector.extract_strided_slice %47 {offsets = [0, 256], sizes = [8, 128], strides = [1, 1]} : vector<8x384xf32> to vector<8x128xf32>
    %55 = vector.extract_strided_slice %51 {offsets = [0, 0], sizes = [8, 128], strides = [1, 1]} : vector<8x384xf32> to vector<8x128xf32>
    %56 = vector.extract_strided_slice %51 {offsets = [0, 128], sizes = [8, 128], strides = [1, 1]} : vector<8x384xf32> to vector<8x128xf32>
    %57 = vector.extract_strided_slice %51 {offsets = [0, 256], sizes = [8, 128], strides = [1, 1]} : vector<8x384xf32> to vector<8x128xf32>
    %58 = arith.addf %57, %11 : vector<8x128xf32>
    %59 = arith.addf %52, %55 : vector<8x128xf32>
    %60 = arith.negf %59 : vector<8x128xf32>
    %61 = math.exp %60 : vector<8x128xf32>
    %cst_28 = arith.constant 1.000000e+00 : f32
    %62 = vector.broadcast %cst_28 : f32 to vector<8x128xf32>
    %63 = arith.addf %62, %61 : vector<8x128xf32>
    %64 = arith.divf %62, %63 : vector<8x128xf32>
    %65 = arith.addf %53, %56 : vector<8x128xf32>
    %66 = arith.negf %65 : vector<8x128xf32>
    %67 = math.exp %66 : vector<8x128xf32>
    %cst_29 = arith.constant 1.000000e+00 : f32
    %68 = vector.broadcast %cst_29 : f32 to vector<8x128xf32>
    %69 = arith.addf %68, %67 : vector<8x128xf32>
    %70 = arith.divf %68, %69 : vector<8x128xf32>
    %71 = arith.mulf %64, %58 : vector<8x128xf32>
    %72 = arith.addf %54, %71 : vector<8x128xf32>
    %73 = math.tanh %72 : vector<8x128xf32>
    %74 = arith.subf %42, %73 : vector<8x128xf32>
    %75 = arith.mulf %70, %74 : vector<8x128xf32>
    %76 = arith.addf %73, %75 : vector<8x128xf32>
    %c1_30 = arith.constant 1 : index
    %c0_31 = arith.constant 0 : index
    %c0_32 = arith.constant 0 : index
    %77 = vector.load %arg6[%c1_30, %c0_31, %c0_32] : memref<8x8x128xf32, #tpu.memory_space<vmem>>, vector<1x8x128xf32>
    %78 = vector.shape_cast %77 : vector<1x8x128xf32> to vector<8x128xf32>
    %79 = vector.shape_cast %76 : vector<8x128xf32> to vector<1x8x128xf32>
    tpu.vector_store %arg6[%c1_30, %c0_31, %c0_32], %79 {strides = array<i32>} : memref<8x8x128xf32, #tpu.memory_space<vmem>>, vector<1x8x128xf32>,
    %c2 = arith.constant 2 : index
    %c0_33 = arith.constant 0 : index
    %c0_34 = arith.constant 0 : index
    %80 = vector.load %arg7[%c2, %c0_33, %c0_34] : memref<8x8x384xf32, #tpu.memory_space<vmem>>, vector<1x8x384xf32>
    %81 = vector.shape_cast %80 : vector<1x8x384xf32> to vector<8x384xf32>
    %82 = vector.extract_strided_slice %76 {offsets = [0, 0], sizes = [8, 32], strides = [1, 1]} : vector<8x128xf32> to vector<8x32xf32>
    %83 = arith.truncf %82 : vector<8x32xf32> to vector<8x32xbf16>
    %c0_35 = arith.constant 0 : index
    %c0_36 = arith.constant 0 : index
    %84 = vector.load %arg3[%c0_35, %c0_36] : memref<32x384xbf16, #tpu.memory_space<vmem>>, vector<32x384xbf16>
    %cst_37 = arith.constant dense<0.000000e+00> : vector<8x384xf32>
    %85 = tpu.matmul %83, %84, %cst_37 {dimension_numbers = #tpu.dot_dimension_numbers<[1], [0], [0], [1], [0, 0, 1, 1], [], []>} : vector<8x32xbf16>, vector<32x384xbf16>, vector<8x384xf32> -> vector<8x384xf32>
    %86 = vector.extract_strided_slice %81 {offsets = [0, 0], sizes = [8, 128], strides = [1, 1]} : vector<8x384xf32> to vector<8x128xf32>
    %87 = vector.extract_strided_slice %81 {offsets = [0, 128], sizes = [8, 128], strides = [1, 1]} : vector<8x384xf32> to vector<8x128xf32>
    %88 = vector.extract_strided_slice %81 {offsets = [0, 256], sizes = [8, 128], strides = [1, 1]} : vector<8x384xf32> to vector<8x128xf32>
    %89 = vector.extract_strided_slice %85 {offsets = [0, 0], sizes = [8, 128], strides = [1, 1]} : vector<8x384xf32> to vector<8x128xf32>
    %90 = vector.extract_strided_slice %85 {offsets = [0, 128], sizes = [8, 128], strides = [1, 1]} : vector<8x384xf32> to vector<8x128xf32>
    %91 = vector.extract_strided_slice %85 {offsets = [0, 256], sizes = [8, 128], strides = [1, 1]} : vector<8x384xf32> to vector<8x128xf32>
    %92 = arith.addf %91, %11 : vector<8x128xf32>
    %93 = arith.addf %86, %89 : vector<8x128xf32>
    %94 = arith.negf %93 : vector<8x128xf32>
    %95 = math.exp %94 : vector<8x128xf32>
    %cst_38 = arith.constant 1.000000e+00 : f32
    %96 = vector.broadcast %cst_38 : f32 to vector<8x128xf32>
    %97 = arith.addf %96, %95 : vector<8x128xf32>
    %98 = arith.divf %96, %97 : vector<8x128xf32>
    %99 = arith.addf %87, %90 : vector<8x128xf32>
    %100 = arith.negf %99 : vector<8x128xf32>
    %101 = math.exp %100 : vector<8x128xf32>
    %cst_39 = arith.constant 1.000000e+00 : f32
    %102 = vector.broadcast %cst_39 : f32 to vector<8x128xf32>
    %103 = arith.addf %102, %101 : vector<8x128xf32>
    %104 = arith.divf %102, %103 : vector<8x128xf32>
    %105 = arith.mulf %98, %92 : vector<8x128xf32>
    %106 = arith.addf %88, %105 : vector<8x128xf32>
    %107 = math.tanh %106 : vector<8x128xf32>
    %108 = arith.subf %76, %107 : vector<8x128xf32>
    %109 = arith.mulf %104, %108 : vector<8x128xf32>
    %110 = arith.addf %107, %109 : vector<8x128xf32>
    %c2_40 = arith.constant 2 : index
    %c0_41 = arith.constant 0 : index
    %c0_42 = arith.constant 0 : index
    %111 = vector.load %arg6[%c2_40, %c0_41, %c0_42] : memref<8x8x128xf32, #tpu.memory_space<vmem>>, vector<1x8x128xf32>
    %112 = vector.shape_cast %111 : vector<1x8x128xf32> to vector<8x128xf32>
    %113 = vector.shape_cast %110 : vector<8x128xf32> to vector<1x8x128xf32>
    tpu.vector_store %arg6[%c2_40, %c0_41, %c0_42], %113 {strides = array<i32>} : memref<8x8x128xf32, #tpu.memory_space<vmem>>, vector<1x8x128xf32>,
    %c3 = arith.constant 3 : index
    %c0_43 = arith.constant 0 : index
    %c0_44 = arith.constant 0 : index
    %114 = vector.load %arg7[%c3, %c0_43, %c0_44] : memref<8x8x384xf32, #tpu.memory_space<vmem>>, vector<1x8x384xf32>
    %115 = vector.shape_cast %114 : vector<1x8x384xf32> to vector<8x384xf32>
    %116 = vector.extract_strided_slice %110 {offsets = [0, 0], sizes = [8, 32], strides = [1, 1]} : vector<8x128xf32> to vector<8x32xf32>
    %117 = arith.truncf %116 : vector<8x32xf32> to vector<8x32xbf16>
    %c0_45 = arith.constant 0 : index
    %c0_46 = arith.constant 0 : index
    %118 = vector.load %arg3[%c0_45, %c0_46] : memref<32x384xbf16, #tpu.memory_space<vmem>>, vector<32x384xbf16>
    %cst_47 = arith.constant dense<0.000000e+00> : vector<8x384xf32>
    %119 = tpu.matmul %117, %118, %cst_47 {dimension_numbers = #tpu.dot_dimension_numbers<[1], [0], [0], [1], [0, 0, 1, 1], [], []>} : vector<8x32xbf16>, vector<32x384xbf16>, vector<8x384xf32> -> vector<8x384xf32>
    %120 = vector.extract_strided_slice %115 {offsets = [0, 0], sizes = [8, 128], strides = [1, 1]} : vector<8x384xf32> to vector<8x128xf32>
    %121 = vector.extract_strided_slice %115 {offsets = [0, 128], sizes = [8, 128], strides = [1, 1]} : vector<8x384xf32> to vector<8x128xf32>
    %122 = vector.extract_strided_slice %115 {offsets = [0, 256], sizes = [8, 128], strides = [1, 1]} : vector<8x384xf32> to vector<8x128xf32>
    %123 = vector.extract_strided_slice %119 {offsets = [0, 0], sizes = [8, 128], strides = [1, 1]} : vector<8x384xf32> to vector<8x128xf32>
    %124 = vector.extract_strided_slice %119 {offsets = [0, 128], sizes = [8, 128], strides = [1, 1]} : vector<8x384xf32> to vector<8x128xf32>
    %125 = vector.extract_strided_slice %119 {offsets = [0, 256], sizes = [8, 128], strides = [1, 1]} : vector<8x384xf32> to vector<8x128xf32>
    %126 = arith.addf %125, %11 : vector<8x128xf32>
    %127 = arith.addf %120, %123 : vector<8x128xf32>
    %128 = arith.negf %127 : vector<8x128xf32>
    %129 = math.exp %128 : vector<8x128xf32>
    %cst_48 = arith.constant 1.000000e+00 : f32
    %130 = vector.broadcast %cst_48 : f32 to vector<8x128xf32>
    %131 = arith.addf %130, %129 : vector<8x128xf32>
    %132 = arith.divf %130, %131 : vector<8x128xf32>
    %133 = arith.addf %121, %124 : vector<8x128xf32>
    %134 = arith.negf %133 : vector<8x128xf32>
    %135 = math.exp %134 : vector<8x128xf32>
    %cst_49 = arith.constant 1.000000e+00 : f32
    %136 = vector.broadcast %cst_49 : f32 to vector<8x128xf32>
    %137 = arith.addf %136, %135 : vector<8x128xf32>
    %138 = arith.divf %136, %137 : vector<8x128xf32>
    %139 = arith.mulf %132, %126 : vector<8x128xf32>
    %140 = arith.addf %122, %139 : vector<8x128xf32>
    %141 = math.tanh %140 : vector<8x128xf32>
    %142 = arith.subf %110, %141 : vector<8x128xf32>
    %143 = arith.mulf %138, %142 : vector<8x128xf32>
    %144 = arith.addf %141, %143 : vector<8x128xf32>
    %c3_50 = arith.constant 3 : index
    %c0_51 = arith.constant 0 : index
    %c0_52 = arith.constant 0 : index
    %145 = vector.load %arg6[%c3_50, %c0_51, %c0_52] : memref<8x8x128xf32, #tpu.memory_space<vmem>>, vector<1x8x128xf32>
    %146 = vector.shape_cast %145 : vector<1x8x128xf32> to vector<8x128xf32>
    %147 = vector.shape_cast %144 : vector<8x128xf32> to vector<1x8x128xf32>
    tpu.vector_store %arg6[%c3_50, %c0_51, %c0_52], %147 {strides = array<i32>} : memref<8x8x128xf32, #tpu.memory_space<vmem>>, vector<1x8x128xf32>,
    %c4 = arith.constant 4 : index
    %c0_53 = arith.constant 0 : index
    %c0_54 = arith.constant 0 : index
    %148 = vector.load %arg7[%c4, %c0_53, %c0_54] : memref<8x8x384xf32, #tpu.memory_space<vmem>>, vector<1x8x384xf32>
    %149 = vector.shape_cast %148 : vector<1x8x384xf32> to vector<8x384xf32>
    %150 = vector.extract_strided_slice %144 {offsets = [0, 0], sizes = [8, 32], strides = [1, 1]} : vector<8x128xf32> to vector<8x32xf32>
    %151 = arith.truncf %150 : vector<8x32xf32> to vector<8x32xbf16>
    %c0_55 = arith.constant 0 : index
    %c0_56 = arith.constant 0 : index
    %152 = vector.load %arg3[%c0_55, %c0_56] : memref<32x384xbf16, #tpu.memory_space<vmem>>, vector<32x384xbf16>
    %cst_57 = arith.constant dense<0.000000e+00> : vector<8x384xf32>
    %153 = tpu.matmul %151, %152, %cst_57 {dimension_numbers = #tpu.dot_dimension_numbers<[1], [0], [0], [1], [0, 0, 1, 1], [], []>} : vector<8x32xbf16>, vector<32x384xbf16>, vector<8x384xf32> -> vector<8x384xf32>
    %154 = vector.extract_strided_slice %149 {offsets = [0, 0], sizes = [8, 128], strides = [1, 1]} : vector<8x384xf32> to vector<8x128xf32>
    %155 = vector.extract_strided_slice %149 {offsets = [0, 128], sizes = [8, 128], strides = [1, 1]} : vector<8x384xf32> to vector<8x128xf32>
    %156 = vector.extract_strided_slice %149 {offsets = [0, 256], sizes = [8, 128], strides = [1, 1]} : vector<8x384xf32> to vector<8x128xf32>
    %157 = vector.extract_strided_slice %153 {offsets = [0, 0], sizes = [8, 128], strides = [1, 1]} : vector<8x384xf32> to vector<8x128xf32>
    %158 = vector.extract_strided_slice %153 {offsets = [0, 128], sizes = [8, 128], strides = [1, 1]} : vector<8x384xf32> to vector<8x128xf32>
    %159 = vector.extract_strided_slice %153 {offsets = [0, 256], sizes = [8, 128], strides = [1, 1]} : vector<8x384xf32> to vector<8x128xf32>
    %160 = arith.addf %159, %11 : vector<8x128xf32>
    %161 = arith.addf %154, %157 : vector<8x128xf32>
    %162 = arith.negf %161 : vector<8x128xf32>
    %163 = math.exp %162 : vector<8x128xf32>
    %cst_58 = arith.constant 1.000000e+00 : f32
    %164 = vector.broadcast %cst_58 : f32 to vector<8x128xf32>
    %165 = arith.addf %164, %163 : vector<8x128xf32>
    %166 = arith.divf %164, %165 : vector<8x128xf32>
    %167 = arith.addf %155, %158 : vector<8x128xf32>
    %168 = arith.negf %167 : vector<8x128xf32>
    %169 = math.exp %168 : vector<8x128xf32>
    %cst_59 = arith.constant 1.000000e+00 : f32
    %170 = vector.broadcast %cst_59 : f32 to vector<8x128xf32>
    %171 = arith.addf %170, %169 : vector<8x128xf32>
    %172 = arith.divf %170, %171 : vector<8x128xf32>
    %173 = arith.mulf %166, %160 : vector<8x128xf32>
    %174 = arith.addf %156, %173 : vector<8x128xf32>
    %175 = math.tanh %174 : vector<8x128xf32>
    %176 = arith.subf %144, %175 : vector<8x128xf32>
    %177 = arith.mulf %172, %176 : vector<8x128xf32>
    %178 = arith.addf %175, %177 : vector<8x128xf32>
    %c4_60 = arith.constant 4 : index
    %c0_61 = arith.constant 0 : index
    %c0_62 = arith.constant 0 : index
    %179 = vector.load %arg6[%c4_60, %c0_61, %c0_62] : memref<8x8x128xf32, #tpu.memory_space<vmem>>, vector<1x8x128xf32>
    %180 = vector.shape_cast %179 : vector<1x8x128xf32> to vector<8x128xf32>
    %181 = vector.shape_cast %178 : vector<8x128xf32> to vector<1x8x128xf32>
    tpu.vector_store %arg6[%c4_60, %c0_61, %c0_62], %181 {strides = array<i32>} : memref<8x8x128xf32, #tpu.memory_space<vmem>>, vector<1x8x128xf32>,
    %c5 = arith.constant 5 : index
    %c0_63 = arith.constant 0 : index
    %c0_64 = arith.constant 0 : index
    %182 = vector.load %arg7[%c5, %c0_63, %c0_64] : memref<8x8x384xf32, #tpu.memory_space<vmem>>, vector<1x8x384xf32>
    %183 = vector.shape_cast %182 : vector<1x8x384xf32> to vector<8x384xf32>
    %184 = vector.extract_strided_slice %178 {offsets = [0, 0], sizes = [8, 32], strides = [1, 1]} : vector<8x128xf32> to vector<8x32xf32>
    %185 = arith.truncf %184 : vector<8x32xf32> to vector<8x32xbf16>
    %c0_65 = arith.constant 0 : index
    %c0_66 = arith.constant 0 : index
    %186 = vector.load %arg3[%c0_65, %c0_66] : memref<32x384xbf16, #tpu.memory_space<vmem>>, vector<32x384xbf16>
    %cst_67 = arith.constant dense<0.000000e+00> : vector<8x384xf32>
    %187 = tpu.matmul %185, %186, %cst_67 {dimension_numbers = #tpu.dot_dimension_numbers<[1], [0], [0], [1], [0, 0, 1, 1], [], []>} : vector<8x32xbf16>, vector<32x384xbf16>, vector<8x384xf32> -> vector<8x384xf32>
    %188 = vector.extract_strided_slice %183 {offsets = [0, 0], sizes = [8, 128], strides = [1, 1]} : vector<8x384xf32> to vector<8x128xf32>
    %189 = vector.extract_strided_slice %183 {offsets = [0, 128], sizes = [8, 128], strides = [1, 1]} : vector<8x384xf32> to vector<8x128xf32>
    %190 = vector.extract_strided_slice %183 {offsets = [0, 256], sizes = [8, 128], strides = [1, 1]} : vector<8x384xf32> to vector<8x128xf32>
    %191 = vector.extract_strided_slice %187 {offsets = [0, 0], sizes = [8, 128], strides = [1, 1]} : vector<8x384xf32> to vector<8x128xf32>
    %192 = vector.extract_strided_slice %187 {offsets = [0, 128], sizes = [8, 128], strides = [1, 1]} : vector<8x384xf32> to vector<8x128xf32>
    %193 = vector.extract_strided_slice %187 {offsets = [0, 256], sizes = [8, 128], strides = [1, 1]} : vector<8x384xf32> to vector<8x128xf32>
    %194 = arith.addf %193, %11 : vector<8x128xf32>
    %195 = arith.addf %188, %191 : vector<8x128xf32>
    %196 = arith.negf %195 : vector<8x128xf32>
    %197 = math.exp %196 : vector<8x128xf32>
    %cst_68 = arith.constant 1.000000e+00 : f32
    %198 = vector.broadcast %cst_68 : f32 to vector<8x128xf32>
    %199 = arith.addf %198, %197 : vector<8x128xf32>
    %200 = arith.divf %198, %199 : vector<8x128xf32>
    %201 = arith.addf %189, %192 : vector<8x128xf32>
    %202 = arith.negf %201 : vector<8x128xf32>
    %203 = math.exp %202 : vector<8x128xf32>
    %cst_69 = arith.constant 1.000000e+00 : f32
    %204 = vector.broadcast %cst_69 : f32 to vector<8x128xf32>
    %205 = arith.addf %204, %203 : vector<8x128xf32>
    %206 = arith.divf %204, %205 : vector<8x128xf32>
    %207 = arith.mulf %200, %194 : vector<8x128xf32>
    %208 = arith.addf %190, %207 : vector<8x128xf32>
    %209 = math.tanh %208 : vector<8x128xf32>
    %210 = arith.subf %178, %209 : vector<8x128xf32>
    %211 = arith.mulf %206, %210 : vector<8x128xf32>
    %212 = arith.addf %209, %211 : vector<8x128xf32>
    %c5_70 = arith.constant 5 : index
    %c0_71 = arith.constant 0 : index
    %c0_72 = arith.constant 0 : index
    %213 = vector.load %arg6[%c5_70, %c0_71, %c0_72] : memref<8x8x128xf32, #tpu.memory_space<vmem>>, vector<1x8x128xf32>
    %214 = vector.shape_cast %213 : vector<1x8x128xf32> to vector<8x128xf32>
    %215 = vector.shape_cast %212 : vector<8x128xf32> to vector<1x8x128xf32>
    tpu.vector_store %arg6[%c5_70, %c0_71, %c0_72], %215 {strides = array<i32>} : memref<8x8x128xf32, #tpu.memory_space<vmem>>, vector<1x8x128xf32>,
    %c6 = arith.constant 6 : index
    %c0_73 = arith.constant 0 : index
    %c0_74 = arith.constant 0 : index
    %216 = vector.load %arg7[%c6, %c0_73, %c0_74] : memref<8x8x384xf32, #tpu.memory_space<vmem>>, vector<1x8x384xf32>
    %217 = vector.shape_cast %216 : vector<1x8x384xf32> to vector<8x384xf32>
    %218 = vector.extract_strided_slice %212 {offsets = [0, 0], sizes = [8, 32], strides = [1, 1]} : vector<8x128xf32> to vector<8x32xf32>
    %219 = arith.truncf %218 : vector<8x32xf32> to vector<8x32xbf16>
    %c0_75 = arith.constant 0 : index
    %c0_76 = arith.constant 0 : index
    %220 = vector.load %arg3[%c0_75, %c0_76] : memref<32x384xbf16, #tpu.memory_space<vmem>>, vector<32x384xbf16>
    %cst_77 = arith.constant dense<0.000000e+00> : vector<8x384xf32>
    %221 = tpu.matmul %219, %220, %cst_77 {dimension_numbers = #tpu.dot_dimension_numbers<[1], [0], [0], [1], [0, 0, 1, 1], [], []>} : vector<8x32xbf16>, vector<32x384xbf16>, vector<8x384xf32> -> vector<8x384xf32>
    %222 = vector.extract_strided_slice %217 {offsets = [0, 0], sizes = [8, 128], strides = [1, 1]} : vector<8x384xf32> to vector<8x128xf32>
    %223 = vector.extract_strided_slice %217 {offsets = [0, 128], sizes = [8, 128], strides = [1, 1]} : vector<8x384xf32> to vector<8x128xf32>
    %224 = vector.extract_strided_slice %217 {offsets = [0, 256], sizes = [8, 128], strides = [1, 1]} : vector<8x384xf32> to vector<8x128xf32>
    %225 = vector.extract_strided_slice %221 {offsets = [0, 0], sizes = [8, 128], strides = [1, 1]} : vector<8x384xf32> to vector<8x128xf32>
    %226 = vector.extract_strided_slice %221 {offsets = [0, 128], sizes = [8, 128], strides = [1, 1]} : vector<8x384xf32> to vector<8x128xf32>
    %227 = vector.extract_strided_slice %221 {offsets = [0, 256], sizes = [8, 128], strides = [1, 1]} : vector<8x384xf32> to vector<8x128xf32>
    %228 = arith.addf %227, %11 : vector<8x128xf32>
    %229 = arith.addf %222, %225 : vector<8x128xf32>
    %230 = arith.negf %229 : vector<8x128xf32>
    %231 = math.exp %230 : vector<8x128xf32>
    %cst_78 = arith.constant 1.000000e+00 : f32
    %232 = vector.broadcast %cst_78 : f32 to vector<8x128xf32>
    %233 = arith.addf %232, %231 : vector<8x128xf32>
    %234 = arith.divf %232, %233 : vector<8x128xf32>
    %235 = arith.addf %223, %226 : vector<8x128xf32>
    %236 = arith.negf %235 : vector<8x128xf32>
    %237 = math.exp %236 : vector<8x128xf32>
    %cst_79 = arith.constant 1.000000e+00 : f32
    %238 = vector.broadcast %cst_79 : f32 to vector<8x128xf32>
    %239 = arith.addf %238, %237 : vector<8x128xf32>
    %240 = arith.divf %238, %239 : vector<8x128xf32>
    %241 = arith.mulf %234, %228 : vector<8x128xf32>
    %242 = arith.addf %224, %241 : vector<8x128xf32>
    %243 = math.tanh %242 : vector<8x128xf32>
    %244 = arith.subf %212, %243 : vector<8x128xf32>
    %245 = arith.mulf %240, %244 : vector<8x128xf32>
    %246 = arith.addf %243, %245 : vector<8x128xf32>
    %c6_80 = arith.constant 6 : index
    %c0_81 = arith.constant 0 : index
    %c0_82 = arith.constant 0 : index
    %247 = vector.load %arg6[%c6_80, %c0_81, %c0_82] : memref<8x8x128xf32, #tpu.memory_space<vmem>>, vector<1x8x128xf32>
    %248 = vector.shape_cast %247 : vector<1x8x128xf32> to vector<8x128xf32>
    %249 = vector.shape_cast %246 : vector<8x128xf32> to vector<1x8x128xf32>
    tpu.vector_store %arg6[%c6_80, %c0_81, %c0_82], %249 {strides = array<i32>} : memref<8x8x128xf32, #tpu.memory_space<vmem>>, vector<1x8x128xf32>,
    %c7 = arith.constant 7 : index
    %c0_83 = arith.constant 0 : index
    %c0_84 = arith.constant 0 : index
    %250 = vector.load %arg7[%c7, %c0_83, %c0_84] : memref<8x8x384xf32, #tpu.memory_space<vmem>>, vector<1x8x384xf32>
    %251 = vector.shape_cast %250 : vector<1x8x384xf32> to vector<8x384xf32>
    %252 = vector.extract_strided_slice %246 {offsets = [0, 0], sizes = [8, 32], strides = [1, 1]} : vector<8x128xf32> to vector<8x32xf32>
    %253 = arith.truncf %252 : vector<8x32xf32> to vector<8x32xbf16>
    %c0_85 = arith.constant 0 : index
    %c0_86 = arith.constant 0 : index
    %254 = vector.load %arg3[%c0_85, %c0_86] : memref<32x384xbf16, #tpu.memory_space<vmem>>, vector<32x384xbf16>
    %cst_87 = arith.constant dense<0.000000e+00> : vector<8x384xf32>
    %255 = tpu.matmul %253, %254, %cst_87 {dimension_numbers = #tpu.dot_dimension_numbers<[1], [0], [0], [1], [0, 0, 1, 1], [], []>} : vector<8x32xbf16>, vector<32x384xbf16>, vector<8x384xf32> -> vector<8x384xf32>
    %256 = vector.extract_strided_slice %251 {offsets = [0, 0], sizes = [8, 128], strides = [1, 1]} : vector<8x384xf32> to vector<8x128xf32>
    %257 = vector.extract_strided_slice %251 {offsets = [0, 128], sizes = [8, 128], strides = [1, 1]} : vector<8x384xf32> to vector<8x128xf32>
    %258 = vector.extract_strided_slice %251 {offsets = [0, 256], sizes = [8, 128], strides = [1, 1]} : vector<8x384xf32> to vector<8x128xf32>
    %259 = vector.extract_strided_slice %255 {offsets = [0, 0], sizes = [8, 128], strides = [1, 1]} : vector<8x384xf32> to vector<8x128xf32>
    %260 = vector.extract_strided_slice %255 {offsets = [0, 128], sizes = [8, 128], strides = [1, 1]} : vector<8x384xf32> to vector<8x128xf32>
    %261 = vector.extract_strided_slice %255 {offsets = [0, 256], sizes = [8, 128], strides = [1, 1]} : vector<8x384xf32> to vector<8x128xf32>
    %262 = arith.addf %261, %11 : vector<8x128xf32>
    %263 = arith.addf %256, %259 : vector<8x128xf32>
    %264 = arith.negf %263 : vector<8x128xf32>
    %265 = math.exp %264 : vector<8x128xf32>
    %cst_88 = arith.constant 1.000000e+00 : f32
    %266 = vector.broadcast %cst_88 : f32 to vector<8x128xf32>
    %267 = arith.addf %266, %265 : vector<8x128xf32>
    %268 = arith.divf %266, %267 : vector<8x128xf32>
    %269 = arith.addf %257, %260 : vector<8x128xf32>
    %270 = arith.negf %269 : vector<8x128xf32>
    %271 = math.exp %270 : vector<8x128xf32>
    %cst_89 = arith.constant 1.000000e+00 : f32
    %272 = vector.broadcast %cst_89 : f32 to vector<8x128xf32>
    %273 = arith.addf %272, %271 : vector<8x128xf32>
    %274 = arith.divf %272, %273 : vector<8x128xf32>
    %275 = arith.mulf %268, %262 : vector<8x128xf32>
    %276 = arith.addf %258, %275 : vector<8x128xf32>
    %277 = math.tanh %276 : vector<8x128xf32>
    %278 = arith.subf %246, %277 : vector<8x128xf32>
    %279 = arith.mulf %274, %278 : vector<8x128xf32>
    %280 = arith.addf %277, %279 : vector<8x128xf32>
    %c7_90 = arith.constant 7 : index
    %c0_91 = arith.constant 0 : index
    %c0_92 = arith.constant 0 : index
    %281 = vector.load %arg6[%c7_90, %c0_91, %c0_92] : memref<8x8x128xf32, #tpu.memory_space<vmem>>, vector<1x8x128xf32>
    %282 = vector.shape_cast %281 : vector<1x8x128xf32> to vector<8x128xf32>
    %283 = vector.shape_cast %280 : vector<8x128xf32> to vector<1x8x128xf32>
    tpu.vector_store %arg6[%c7_90, %c0_91, %c0_92], %283 {strides = array<i32>} : memref<8x8x128xf32, #tpu.memory_space<vmem>>, vector<1x8x128xf32>,
    return
  }
}

</mosaic_0001>

<bundles_post_ra>
// kernel: gru_forward.1
= control target key start
LH: loop header
LB: loop body
LE: loop exit
PB: predicated region body
PF: predicated region fallthrough
CT: control target
= control target key end

     0   :  { %v35_v0 = vlaneseq  ;;  %v1815_v2 = vmov 1983009808   ;;  %vm87_vm0 = vcmask 31744   ;;  %v1816_v8 = vmov 0   ;;  %s2187_s2 = inlined_call_operand.vmem [shape: bf16[4,384], index: 2, kind: input, shape index: {}]   ;;  %s2188_s0 = inlined_call_operand.vmem [shape: bf16[64,4], index: 0, kind: input, shape index: {}]   ;;  %s2189_s3 = inlined_call_operand.vmem [shape: bf16[32,384], index: 3, kind: input, shape index: {}]   ;;  %s2190_s1 = inlined_call_operand.vmem [shape: f32[8,128], index: 1, kind: input, shape index: {}]   ;;  %s2191_s4 = inlined_call_operand.vmem [shape: f32[1,384], index: 4, kind: input, shape index: {}]   ;;  %s2192_s5 = inlined_call_operand.vmem [shape: f32[1,128], index: 5, kind: input, shape index: {}]   ;;  %s2193_s6 = inlined_call_operand.vmem [shape: f32[8,8,128], index: 6, kind: output, shape index: {}]  }
   0x1   :  { %v32_v1 = vld [vmem:[%s2187_s2] sm:$0x3f]  ;;  %v73_v3 = vunpack.c.l.s4 %v1815_v2  ;;  %142 = vmatprep.mubr.bf16.mxu0 %v1816_v8  ;;  %vm100_vm1 = vcmask 1041408   ;;  %v1868_v11 = vld [vmem:[%s2189_s3 + $0x1c] ss:$12 sps:$4 sm:$0xff]   ;;  %v1714_v18 = vld [vmem:[%s2188_s0 + $0x10] sm:$0xff]  }
   0x2   :  { %v1857_v4 = vshrl.u32 %v35_v0, 7  ;;  %v1709_v5 = vld [vmem:[%s2188_s0] sm:$0xff]   ;;  %v71_v6 = vcombine.high %v32_v1, %v32_v1  ;;  %v1710_v13 = vld [vmem:[%s2188_s0 + $0x8] sm:$0xff]   ;;  %v1715_v21 = vld [vmem:[%s2188_s0 + $0x18] sm:$0xff]   ;;  %v1817_v22 = vmov 0.0   ;;  %vm324_vm2 = vcmask 261120  }
   0x3   :  { %v74_v7 = vunpack.c.0.s8 %v73_v3  ;;  %1631 = vmatprep.mubr.msk.bf16.mxu1 %vm87_vm0, %v1709_v5  ;;  %v1876_v14 = vld [vmem:[%s2189_s3 + $0x18] ss:$12 sps:$4 sm:$0xff]   ;;  %v1890_v20 = vld [vmem:[%s2189_s3] ss:$12 sps:$4 sm:$0xff]   ;;  %v1720_v26 = vld [vmem:[%s2189_s3 + $0x8] ss:$12 sps:$4 sm:$0xff]  }
   0x4   :  { %v1885_v19 = vld [vmem:[%s2189_s3 + $0x4] ss:$12 sps:$4 sm:$0xff]   ;;  %v1719_v25 = vld [vmem:[%s2189_s3 + $0x20] ss:$12 sps:$4 sm:$0xff]   ;;  %vm1818_vm3 = vmmov 0   ;;  %v45_v29 = vsub.s32 2, %v1857_v4 }
   0x5   :  { %v77_v9 = vsub.s32 %v74_v7, %v1857_v4  ;;  %v1913_v23 = vld [vmem:[%s2190_s1] sm:$0xff]  ;;  %v1722_v28 = vld [vmem:[%s2189_s3 + $0x8] ss:$12 sps:$4 sm:$0xff]   ;;  %v37_v38 = vsub.s32 0, %v1857_v4  ;;  %v41_v42 = vsub.s32 1, %v1857_v4 }
   0x6   :  { %v283_v24 = vpack.c.bf16 %v1913_v23, %v1913_v23  ;;  %v1721_v27 = vld [vmem:[%s2189_s3 + $0x20] ss:$12 sps:$4 sm:$0xff]  }
   0x7   :  { %v85_v10 = vrot.slane %v71_v6, %v77_v9  ;;  %v78_v12 = vrot.slane %v32_v1, %v77_v9  ;;  %v33_v30 = vld [vmem:[%s2191_s4] sm:$0x7] }
   0x8   :  { %v1949_v31 = vrot.slane %v33_v30, %v45_v29  ;;  %v1968_v46 = vrot.slane %v33_v30, %v37_v38  ;;  %v1973_v50 = vrot.slane %v33_v30, %v41_v42 }
   0x9   :  { %1703 = vmatprep.subr.msk.bf16.mxu1 %vm100_vm1, %v85_v10  ;;  %v108_v15 = vsel %vm100_vm1, %v85_v10, 0  ;;  %v86_v16 = vcombine.high %v78_v12, %v78_v12  ;;  %v102_v17 = vsel %vm100_vm1, %v78_v12, 0 }
   0xa   :  { %1630 = vmatpush3.bf16.msra.mxu1 %v108_v15 }
   0xb   :  { %340 = vmatprep.subr.bf16.mxu1 %v1868_v11  ;;  %1503 = vmatprep.subr.msk.bf16.mxu0 %vm100_vm1, %v86_v16 }
   0xc   :  { %125 = vmatpush1.bf16.msra.mxu0 %v102_v17 }
   0xd   :  { %1632 = vmatmul.mubr.msk.bf16.vlgmr.msra.gmra.mxu1 %vm87_vm0, %v1710_v13  ;;  %491 = vmatprep.subr.bf16.mxu0 %v1868_v11 }
   0xe   :  { %341 = vmatpush1.bf16.msra.mxu1 %v1876_v14  ;;  %1635 = vmatprep.mubr.msk.bf16.mxu1 %vm87_vm0, %v1714_v18 }
   0xf   :  { %342 = vmatprep.subr.bf16.mxu1 %v1885_v19  ;;  %1504 = vmatmul.mubr.msk.bf16.vlgmr.msra.gmra.mxu0 %vm87_vm0, %v1709_v5 }
  0x10   :  { %492 = vmatpush1.bf16.msra.mxu0 %v1876_v14  ;;  %152 = vmatprep.mubr.bf16.mxu0 %v1816_v8 }
  0x11   :  { %493 = vmatprep.subr.bf16.mxu0 %v1885_v19 }
  0x12   :  { %343 = vmatpush1.bf16.msra.mxu1 %v1890_v20 }
  0x13   :  { %1639 = vmatprep.subr.bf16.mxu1 %v1817_v22 }
  0x14   :  { %494 = vmatpush1.bf16.msra.mxu0 %v1890_v20 }
  0x15   :  { %1636 = vmatmul.mubr.msk.bf16.gmra.mxu1 %vm87_vm0, %v1715_v21  ;;  %643 = vmatprep.subr.bf16.mxu0 %v1868_v11 }
  0x16   :  { %360 = vmatprep.mubr.bf16.mxu1 %v1816_v8 }
  0x17   :  { %1505 = vmatmul.mubr.msk.bf16.gmra.mxu0 %vm87_vm0, %v1710_v13 }
  0x18   :  { %162 = vmatprep.mubr.bf16.mxu0 %v1816_v8 }
  0x1d   :  { %1519 = vmatmul.mubr.msk.bf16.vlgmr.msra.gmra.mxu1 %vm324_vm2, %v283_v24 }
  0x1e   :  { %1640 = vmatpush3.bf16.msra.mxu1 %v1719_v25  ;;  %1643 = vmatprep.mubr.msk.bf16.mxu1 %vm1818_vm3, %v1817_v22 }
  0x1f   :  { %1641 = vmatprep.subr.bf16.mxu1 %v1817_v22  ;;  %1506 = vmatmul.mubr.msk.bf16.gmra.mxu0 %vm87_vm0, %v1714_v18 }
  0x20   :  { %172 = vmatprep.mubr.bf16.mxu0 %v1816_v8 }
  0x22   :  { %1642 = vmatpush3.bf16.msra.mxu1 %v1720_v26 }
  0x23   :  { %1647 = vmatprep.subr.bf16.mxu1 %v1817_v22 }
  0x25   :  { %1644 = vmatmul.mubr.msk.bf16.vlgmr.msra.gmra.mxu1 %vm324_vm2, %v283_v24 }
  0x26   :  { %1651 = vmatprep.mubr.msk.bf16.mxu1 %vm1818_vm3, %v1817_v22  ;;  %1648 = vmatpush3.bf16.msra.mxu1 %v1721_v27 }
  0x27   :  { %1507 = vmatmul.mubr.msk.bf16.gmra.mxu0 %vm87_vm0, %v1715_v21  ;;  %1649 = vmatprep.subr.bf16.mxu1 %v1817_v22 }
  0x28   :  { %511 = vmatprep.mubr.bf16.mxu0 %v1816_v8 }
  0x2a   :  { %1650 = vmatpush3.bf16.msra.mxu1 %v1722_v28 }
  0x2b   :  { %1655 = vmatprep.subr.bf16.mxu1 %v1817_v22 }
  0xcd   :  { %v1633_v32 = vpop.f32.mrf.mxu1 }
  0xce   :  { %v1952_v33 = vadd.f32 %v1633_v32, %v1949_v31 }
  0xcf   :  { %v1954_v34 = vpop.f32.mrf.mxu1  ;;  %v144_v35 = vpop.f32.mrf.mxu0 }
  0xd0   :  { %v145_v55 = vadd.f32 %v144_v35, %v1968_v46 }
  0xd1   :  { %v1634_v36 = vpop.f32.mrf.mxu1  ;;  %v146_v37 = vpop.f32.mrf.mxu0 }
  0xd2   :  { %v1958_v39 = vadd.f32 %v1634_v36, %v1949_v31  ;;  %v147_v18 = vadd.f32 %v146_v37, %v1973_v50  ;;  %v2022_v37 = vld [vmem:[%s2192_s5] ss:$0 sm:$0xff] }
  0xd3   :  { %v220_v40 = vpop.f32.mrf.mxu1  ;;  %v1960_v41 = vpop.f32.mrf.mxu0 }
  0xd4   :  { %v1964_v43 = vadd.f32 %v220_v40, %v1949_v31 }
  0xd5   :  { %v1637_v44 = vpop.f32.mrf.mxu1  ;;  %v1966_v45 = vpop.f32.mrf.mxu0 }
  0xd6   :  { %v1971_v47 = vadd.f32 %v1637_v44, %v1949_v31 }
  0xd7   :  { %v233_v48 = vpop.f32.mrf.mxu1  ;;  %v154_v49 = vpop.f32.mrf.mxu0 }
  0xd8   :  { %v1976_v51 = vadd.f32 %v233_v48, %v1949_v31  ;;  %v1979_v52 = vadd.f32 %v154_v49, %v1968_v46  ;;  %v218_v49 = vadd.f32 %v1954_v34, %v1949_v31 }
  0xd9   :  { %v1638_v53 = vpop.f32.mrf.mxu1  ;;  %v156_v54 = vpop.f32.mrf.mxu0 }
  0xda   :  { %v1983_v56 = vadd.f32 %v1638_v53, %v1949_v31  ;;  %v1986_v57 = vadd.f32 %v156_v54, %v1973_v50 }
  0xdb   :  { %v236_v58 = vpop.f32.mrf.mxu1  ;;  %v158_v59 = vpop.f32.mrf.mxu0 }
  0xdc   :  { %v1989_v60 = vadd.f32 %v236_v58, %v1949_v31  ;;  %v1992_v61 = vadd.f32 %v158_v59, %v1968_v46  ;;  %v1724_v31 = vld [vmem:[%s2189_s3 + $0x8] ss:$12 sps:$4 sm:$0xff]  }
  0xdd   :  { %v362_v62 = vpop.f32.mrf.mxu1  ;;  %v160_v63 = vpop.f32.mrf.mxu0 }
  0xde   :  { %v410_v0 = vadd.f32 %v362_v62, %v145_v55  ;;  %v1995_v1 = vadd.f32 %v160_v63, %v1973_v50 }
  0xdf   :  { %v364_v2 = vpop.f32.mrf.mxu1  ;;  %v164_v3 = vpop.f32.mrf.mxu0 }
  0xe0   :  { %v1521_v4 = vmul.f32 -1.442695, %v410_v0  ;;  %v1998_v5 = vadd.f32 %v164_v3, %v1968_v46  ;;  %v417_v26 = vadd.f32 %v364_v2, %v147_v18  ;;  %v149_v3 = vadd.f32 %v1960_v41, %v1968_v46 }
  0xe1   :  { %v366_v6 = vpop.f32.mrf.mxu1  ;;  %v166_v7 = vpop.f32.mrf.mxu0 }
  0xe2   :  { %1735 = vpow2.f32 %v1521_v4  ;;  %v2001_v9 = vadd.f32 %v166_v7, %v1973_v50  ;;  %v1522_v36 = vmul.f32 -1.442695, %v417_v26  ;;  %v151_v26 = vadd.f32 %v1966_v45, %v1973_v50 }
  0xe3   :  { %v367_v10 = vpop.f32.mrf.mxu1  ;;  %v168_v12 = vpop.f32.mrf.mxu0 }
  0xe4   :  { %v2004_v13 = vadd.f32 %v168_v12, %v1968_v46  ;;  %1737 = vpow2.f32 %v1522_v36 }
  0xe5   :  { %v403_v15 = vpop.f32.mrf.mxu1  ;;  %v170_v16 = vpop.f32.mrf.mxu0 }
  0xe6   :  { %v2007_v17 = vadd.f32 %v170_v16, %v1973_v50  ;;  %v409_v42 = vadd.f32 %v2022_v37, %v403_v15 }
  0xe7   :  { %v1645_v21 = vpop.f32.mrf.mxu1  ;;  %v174_v24 = vpop.f32.mrf.mxu0 }
  0xe8   :  { %v2011_v25 = vadd.f32 %v174_v24, %v1968_v46 }
  0xe9   :  { %v406_v27 = vpop.f32.mrf.mxu1  ;;  %v176_v28 = vpop.f32.mrf.mxu0 }
  0xea   :  { %v2014_v29 = vadd.f32 %v176_v28, %v1973_v50 }
  0xeb   :  { %v1646_v30 = vpop.f32.mrf.mxu1  ;;  %v178_v32 = vpop.f32.mrf.mxu0 }
  0xec   :  { %v2017_v35 = vadd.f32 %v178_v32, %v1968_v46 }
  0xed   :  { %v2048_v34 = vpop.f32.mrf.mxu0 }
  0xef   :  { %v1736_v38 = vpop.eup %1735 }
  0xf0   :  { %v414_v40 = vadd.f32 1.0, %v1736_v38 }
  0xf1   :  { %v1738_v44 = vpop.eup %1737 }
  0xf2   :  { %1739 = vrcp.f32 %v414_v40  ;;  %v421_v54 = vadd.f32 1.0, %v1738_v44 }
  0xff   :  { %v1740_v48 = vpop.eup %1739 }
 0x100   :  { %v424_v53 = vmul.f32 %v1740_v48, %v409_v42 }
 0x102   :  { %v425_v55 = vadd.f32 %v424_v53, %v218_v49 }
 0x104   :  { %1741 = vtanh.f32 %v425_v55  ;;  %v1726_v55 = vld [vmem:[%s2189_s3 + $0x8] ss:$12 sps:$4 sm:$0xff]  }
 0x105   :  { %1743 = vrcp.f32 %v421_v54 }
 0x111   :  { %v1742_v58 = vpop.eup %1741 }
 0x112   :  { %v427_v59 = vsub.f32 %v1913_v23, %v1742_v58  ;;  %v1744_v62 = vpop.eup %1743  ;;  %v1723_v23 = vld [vmem:[%s2189_s3 + $0x20] ss:$12 sps:$4 sm:$0xff]  }
 0x114   :  { %v428_v63 = vmul.f32 %v1744_v62, %v427_v59 }
 0x116   :  { %v429_v0 = vadd.f32 %v1742_v58, %v428_v63 }
 0x118   :  { %430 = vst [vmem:[%s2193_s6] sm:$0xff] %v429_v0  ;;  %v435_v2 = vpack.c.bf16 %v429_v0, %v429_v0 }
 0x11a   :  { %1529 = vmatmul.mubr.msk.bf16.vlgmr.msra.gmra.mxu0 %vm324_vm2, %v435_v2  ;;  %1652 = vmatmul.mubr.msk.bf16.vlgmr.msra.gmra.mxu1 %vm324_vm2, %v435_v2 }
 0x11b   :  { %644 = vmatpush1.bf16.msra.mxu0 %v1876_v14  ;;  %663 = vmatprep.mubr.bf16.mxu0 %v1816_v8 }
 0x11c   :  { %645 = vmatprep.subr.bf16.mxu0 %v1885_v19  ;;  %1659 = vmatprep.mubr.msk.bf16.mxu1 %vm1818_vm3, %v1817_v22 }
 0x11d   :  { %1656 = vmatpush3.bf16.msra.mxu1 %v1723_v23 }
 0x11e   :  { %1657 = vmatprep.subr.bf16.mxu1 %v1817_v22 }
 0x11f   :  { %646 = vmatpush1.bf16.msra.mxu0 %v1890_v20 }
 0x120   :  { %795 = vmatprep.subr.bf16.mxu0 %v1868_v11 }
 0x121   :  { %1658 = vmatpush3.bf16.msra.mxu1 %v1724_v31 }
 0x122   :  { %1663 = vmatprep.subr.bf16.mxu1 %v1817_v22 }
 0x1da   :  { %v513_v4 = vpop.f32.mrf.mxu0  ;;  %v554_v6 = vpop.f32.mrf.mxu1 }
 0x1db   :  { %v561_v7 = vadd.f32 %v513_v4, %v149_v3  ;;  %v560_v46 = vadd.f32 %v2022_v37, %v554_v6 }
 0x1dc   :  { %v515_v10 = vpop.f32.mrf.mxu0  ;;  %v1653_v12 = vpop.f32.mrf.mxu1 }
 0x1dd   :  { %v1531_v15 = vmul.f32 -1.442695, %v561_v7  ;;  %v568_v27 = vadd.f32 %v515_v10, %v151_v26 }
 0x1de   :  { %v517_v16 = vpop.f32.mrf.mxu0  ;;  %v557_v18 = vpop.f32.mrf.mxu1 }
 0x1df   :  { %1745 = vpow2.f32 %v1531_v15  ;;  %v1532_v28 = vmul.f32 -1.442695, %v568_v27 }
 0x1e0   :  { %v518_v21 = vpop.f32.mrf.mxu0  ;;  %v1654_v24 = vpop.f32.mrf.mxu1 }
 0x1e1   :  { %1747 = vpow2.f32 %v1532_v28 }
 0x1ec   :  { %v1746_v30 = vpop.eup %1745 }
 0x1ed   :  { %v565_v32 = vadd.f32 1.0, %v1746_v30 }
 0x1ee   :  { %v1748_v41 = vpop.eup %1747 }
 0x1ef   :  { %1749 = vrcp.f32 %v565_v32  ;;  %v572_v42 = vadd.f32 1.0, %v1748_v41  ;;  %v1728_v41 = vld [vmem:[%s2189_s3 + $0x8] ss:$12 sps:$4 sm:$0xff]  }
 0x1fc   :  { %v1750_v36 = vpop.eup %1749 }
 0x1fd   :  { %v575_v38 = vmul.f32 %v1750_v36, %v560_v46 }
 0x1ff   :  { %v576_v40 = vadd.f32 %v575_v38, %v1964_v43  ;;  %v1725_v43 = vld [vmem:[%s2189_s3 + $0x20] ss:$12 sps:$4 sm:$0xff]  }
 0x201   :  { %1751 = vtanh.f32 %v576_v40 }
 0x202   :  { %1753 = vrcp.f32 %v572_v42 }
 0x20e   :  { %v1752_v44 = vpop.eup %1751 }
 0x20f   :  { %v578_v48 = vsub.f32 %v429_v0, %v1752_v44  ;;  %v1754_v49 = vpop.eup %1753 }
 0x211   :  { %v579_v45 = vmul.f32 %v1754_v49, %v578_v48 }
 0x213   :  { %v580_v53 = vadd.f32 %v1752_v44, %v579_v45 }
 0x215   :  { %1533 = vst [vmem:[%s2193_s6 + $0x8] sm:$0xff] %v580_v53  ;;  %v587_v54 = vpack.c.bf16 %v580_v53, %v580_v53 }
 0x217   :  { %1540 = vmatmul.mubr.msk.bf16.vlgmr.msra.gmra.mxu0 %vm324_vm2, %v587_v54  ;;  %1660 = vmatmul.mubr.msk.bf16.vlgmr.msra.gmra.mxu1 %vm324_vm2, %v587_v54 }
 0x218   :  { %796 = vmatpush1.bf16.msra.mxu0 %v1876_v14  ;;  %815 = vmatprep.mubr.bf16.mxu0 %v1816_v8 }
 0x219   :  { %797 = vmatprep.subr.bf16.mxu0 %v1885_v19  ;;  %1667 = vmatprep.mubr.msk.bf16.mxu1 %vm1818_vm3, %v1817_v22 }
 0x21a   :  { %1664 = vmatpush3.bf16.msra.mxu1 %v1725_v43 }
 0x21b   :  { %1665 = vmatprep.subr.bf16.mxu1 %v1817_v22 }
 0x21c   :  { %798 = vmatpush1.bf16.msra.mxu0 %v1890_v20 }
 0x21d   :  { %947 = vmatprep.subr.bf16.mxu0 %v1868_v11 }
 0x21e   :  { %1666 = vmatpush3.bf16.msra.mxu1 %v1726_v55 }
 0x21f   :  { %1671 = vmatprep.subr.bf16.mxu1 %v1817_v22 }
 0x2d7   :  { %v665_v58 = vpop.f32.mrf.mxu0  ;;  %v706_v59 = vpop.f32.mrf.mxu1 }
 0x2d8   :  { %v713_v62 = vadd.f32 %v665_v58, %v1979_v52  ;;  %v712_v16 = vadd.f32 %v2022_v37, %v706_v59 }
 0x2d9   :  { %v667_v63 = vpop.f32.mrf.mxu0  ;;  %v1661_v0 = vpop.f32.mrf.mxu1 }
 0x2da   :  { %v1542_v2 = vmul.f32 -1.442695, %v713_v62  ;;  %v720_v6 = vadd.f32 %v667_v63, %v1986_v57 }
 0x2db   :  { %v669_v23 = vpop.f32.mrf.mxu0  ;;  %v709_v31 = vpop.f32.mrf.mxu1 }
 0x2dc   :  { %1755 = vpow2.f32 %v1542_v2  ;;  %v1543_v7 = vmul.f32 -1.442695, %v720_v6 }
 0x2dd   :  { %v670_v3 = vpop.f32.mrf.mxu0  ;;  %v1662_v4 = vpop.f32.mrf.mxu1 }
 0x2de   :  { %1757 = vpow2.f32 %v1543_v7  ;;  %v1730_v7 = vld [vmem:[%s2189_s3 + $0x8] ss:$12 sps:$4 sm:$0xff]  }
 0x2e9   :  { %v1756_v10 = vpop.eup %1755 }
 0x2ea   :  { %v717_v12 = vadd.f32 1.0, %v1756_v10 }
 0x2eb   :  { %v1758_v15 = vpop.eup %1757 }
 0x2ec   :  { %1759 = vrcp.f32 %v717_v12  ;;  %v724_v24 = vadd.f32 1.0, %v1758_v15 }
 0x2f9   :  { %v1760_v18 = vpop.eup %1759 }
 0x2fa   :  { %v727_v52 = vmul.f32 %v1760_v18, %v712_v16 }
 0x2fc   :  { %v728_v21 = vadd.f32 %v727_v52, %v1952_v33  ;;  %v1727_v33 = vld [vmem:[%s2189_s3 + $0x20] ss:$12 sps:$4 sm:$0xff]  }
 0x2fe   :  { %1761 = vtanh.f32 %v728_v21 }
 0x2ff   :  { %1763 = vrcp.f32 %v724_v24 }
 0x30b   :  { %v1762_v26 = vpop.eup %1761 }
 0x30c   :  { %v730_v27 = vsub.f32 %v580_v53, %v1762_v26  ;;  %v1764_v28 = vpop.eup %1763 }
 0x30e   :  { %v731_v30 = vmul.f32 %v1764_v28, %v730_v27 }
 0x310   :  { %v732_v57 = vadd.f32 %v1762_v26, %v731_v30 }
 0x312   :  { %1544 = vst [vmem:[%s2193_s6 + $0x10] sm:$0xff] %v732_v57  ;;  %v739_v32 = vpack.c.bf16 %v732_v57, %v732_v57 }
 0x314   :  { %1551 = vmatmul.mubr.msk.bf16.vlgmr.msra.gmra.mxu0 %vm324_vm2, %v739_v32  ;;  %1668 = vmatmul.mubr.msk.bf16.vlgmr.msra.gmra.mxu1 %vm324_vm2, %v739_v32 }
 0x315   :  { %948 = vmatpush1.bf16.msra.mxu0 %v1876_v14  ;;  %967 = vmatprep.mubr.bf16.mxu0 %v1816_v8 }
 0x316   :  { %949 = vmatprep.subr.bf16.mxu0 %v1885_v19  ;;  %1675 = vmatprep.mubr.msk.bf16.mxu1 %vm1818_vm3, %v1817_v22 }
 0x317   :  { %1672 = vmatpush3.bf16.msra.mxu1 %v1727_v33 }
 0x318   :  { %1673 = vmatprep.subr.bf16.mxu1 %v1817_v22 }
 0x319   :  { %950 = vmatpush1.bf16.msra.mxu0 %v1890_v20 }
 0x31a   :  { %1099 = vmatprep.subr.bf16.mxu0 %v1868_v11 }
 0x31b   :  { %1674 = vmatpush3.bf16.msra.mxu1 %v1728_v41 }
 0x31c   :  { %1679 = vmatprep.subr.bf16.mxu1 %v1817_v22 }
 0x3d4   :  { %v817_v46 = vpop.f32.mrf.mxu0  ;;  %v858_v36 = vpop.f32.mrf.mxu1 }
 0x3d5   :  { %v865_v38 = vadd.f32 %v817_v46, %v1992_v61  ;;  %v864_v62 = vadd.f32 %v2022_v37, %v858_v36 }
 0x3d6   :  { %v819_v40 = vpop.f32.mrf.mxu0  ;;  %v1669_v42 = vpop.f32.mrf.mxu1 }
 0x3d7   :  { %v1553_v44 = vmul.f32 -1.442695, %v865_v38  ;;  %v872_v54 = vadd.f32 %v819_v40, %v1995_v1 }
 0x3d8   :  { %v821_v48 = vpop.f32.mrf.mxu0  ;;  %v861_v49 = vpop.f32.mrf.mxu1 }
 0x3d9   :  { %1765 = vpow2.f32 %v1553_v44  ;;  %v1554_v43 = vmul.f32 -1.442695, %v872_v54 }
 0x3da   :  { %v822_v45 = vpop.f32.mrf.mxu0  ;;  %v1670_v53 = vpop.f32.mrf.mxu1 }
 0x3db   :  { %1767 = vpow2.f32 %v1554_v43  ;;  %v1732_v45 = vld [vmem:[%s2189_s3 + $0x8] ss:$12 sps:$4 sm:$0xff]  }
 0x3e6   :  { %v1766_v55 = vpop.eup %1765 }
 0x3e7   :  { %v869_v58 = vadd.f32 1.0, %v1766_v55 }
 0x3e8   :  { %v1768_v59 = vpop.eup %1767 }
 0x3e9   :  { %1769 = vrcp.f32 %v869_v58  ;;  %v876_v2 = vadd.f32 1.0, %v1768_v59 }
 0x3f6   :  { %v1770_v63 = vpop.eup %1769 }
 0x3f7   :  { %v879_v61 = vmul.f32 %v1770_v63, %v864_v62 }
 0x3f9   :  { %v880_v0 = vadd.f32 %v879_v61, %v1958_v39  ;;  %v1729_v39 = vld [vmem:[%s2189_s3 + $0x20] ss:$12 sps:$4 sm:$0xff]  }
 0x3fb   :  { %1771 = vtanh.f32 %v880_v0 }
 0x3fc   :  { %1773 = vrcp.f32 %v876_v2 }
 0x408   :  { %v1772_v23 = vpop.eup %1771 }
 0x409   :  { %v882_v31 = vsub.f32 %v732_v57, %v1772_v23  ;;  %v1774_v3 = vpop.eup %1773 }
 0x40b   :  { %v883_v4 = vmul.f32 %v1774_v3, %v882_v31 }
 0x40d   :  { %v884_v1 = vadd.f32 %v1772_v23, %v883_v4 }
 0x40f   :  { %1555 = vst [vmem:[%s2193_s6 + $0x18] sm:$0xff] %v884_v1  ;;  %v891_v6 = vpack.c.bf16 %v884_v1, %v884_v1 }
 0x411   :  { %1562 = vmatmul.mubr.msk.bf16.vlgmr.msra.gmra.mxu0 %vm324_vm2, %v891_v6  ;;  %1676 = vmatmul.mubr.msk.bf16.vlgmr.msra.gmra.mxu1 %vm324_vm2, %v891_v6 }
 0x412   :  { %1100 = vmatpush1.bf16.msra.mxu0 %v1876_v14  ;;  %1119 = vmatprep.mubr.bf16.mxu0 %v1816_v8 }
 0x413   :  { %1101 = vmatprep.subr.bf16.mxu0 %v1885_v19  ;;  %1683 = vmatprep.mubr.msk.bf16.mxu1 %vm1818_vm3, %v1817_v22 }
 0x414   :  { %1680 = vmatpush3.bf16.msra.mxu1 %v1729_v39 }
 0x415   :  { %1681 = vmatprep.subr.bf16.mxu1 %v1817_v22 }
 0x416   :  { %1102 = vmatpush1.bf16.msra.mxu0 %v1890_v20 }
 0x417   :  { %1251 = vmatprep.subr.bf16.mxu0 %v1868_v11 }
 0x418   :  { %1682 = vmatpush3.bf16.msra.mxu1 %v1730_v7 }
 0x419   :  { %1687 = vmatprep.subr.bf16.mxu1 %v1817_v22 }
 0x4d1   :  { %v969_v10 = vpop.f32.mrf.mxu0  ;;  %v1010_v12 = vpop.f32.mrf.mxu1 }
 0x4d2   :  { %v1017_v15 = vadd.f32 %v969_v10, %v1998_v5  ;;  %v1016_v41 = vadd.f32 %v2022_v37, %v1010_v12 }
 0x4d3   :  { %v971_v16 = vpop.f32.mrf.mxu0  ;;  %v1677_v18 = vpop.f32.mrf.mxu1 }
 0x4d4   :  { %v1564_v52 = vmul.f32 -1.442695, %v1017_v15  ;;  %v1024_v28 = vadd.f32 %v971_v16, %v2001_v9  ;;  %v1734_v18 = vld [vmem:[%s2189_s3 + $0x8] ss:$12 sps:$4 sm:$0xff]  }
 0x4d5   :  { %v973_v21 = vpop.f32.mrf.mxu0  ;;  %v1013_v24 = vpop.f32.mrf.mxu1 }
 0x4d6   :  { %1775 = vpow2.f32 %v1564_v52  ;;  %v1565_v30 = vmul.f32 -1.442695, %v1024_v28 }
 0x4d7   :  { %v974_v26 = vpop.f32.mrf.mxu0  ;;  %v1678_v27 = vpop.f32.mrf.mxu1 }
 0x4d8   :  { %1777 = vpow2.f32 %v1565_v30 }
 0x4e3   :  { %v1776_v57 = vpop.eup %1775 }
 0x4e4   :  { %v1021_v32 = vadd.f32 1.0, %v1776_v57 }
 0x4e5   :  { %v1778_v33 = vpop.eup %1777 }
 0x4e6   :  { %1779 = vrcp.f32 %v1021_v32  ;;  %v1028_v38 = vadd.f32 1.0, %v1778_v33 }
 0x4f3   :  { %v1780_v46 = vpop.eup %1779 }
 0x4f4   :  { %v1031_v5 = vmul.f32 %v1780_v46, %v1016_v41 }
 0x4f6   :  { %v1032_v36 = vadd.f32 %v1031_v5, %v1976_v51  ;;  %v1731_v51 = vld [vmem:[%s2189_s3 + $0x20] ss:$12 sps:$4 sm:$0xff]  }
 0x4f8   :  { %1781 = vtanh.f32 %v1032_v36 }
 0x4f9   :  { %1783 = vrcp.f32 %v1028_v38 }
 0x505   :  { %v1782_v40 = vpop.eup %1781 }
 0x506   :  { %v1034_v42 = vsub.f32 %v884_v1, %v1782_v40  ;;  %v1784_v44 = vpop.eup %1783 }
 0x508   :  { %v1035_v48 = vmul.f32 %v1784_v44, %v1034_v42 }
 0x50a   :  { %v1036_v9 = vadd.f32 %v1782_v40, %v1035_v48 }
 0x50c   :  { %1566 = vst [vmem:[%s2193_s6 + $0x20] sm:$0xff] %v1036_v9  ;;  %v1043_v49 = vpack.c.bf16 %v1036_v9, %v1036_v9 }
 0x50e   :  { %1573 = vmatmul.mubr.msk.bf16.vlgmr.msra.gmra.mxu0 %vm324_vm2, %v1043_v49  ;;  %1684 = vmatmul.mubr.msk.bf16.vlgmr.msra.gmra.mxu1 %vm324_vm2, %v1043_v49 }
 0x50f   :  { %1252 = vmatpush1.bf16.msra.mxu0 %v1876_v14  ;;  %1271 = vmatprep.mubr.bf16.mxu0 %v1816_v8 }
 0x510   :  { %1253 = vmatprep.subr.bf16.mxu0 %v1885_v19  ;;  %1691 = vmatprep.mubr.msk.bf16.mxu1 %vm1818_vm3, %v1817_v22 }
 0x511   :  { %1688 = vmatpush3.bf16.msra.mxu1 %v1731_v51 }
 0x512   :  { %1689 = vmatprep.subr.bf16.mxu1 %v1817_v22 }
 0x513   :  { %1254 = vmatpush1.bf16.msra.mxu0 %v1890_v20 }
 0x514   :  { %1403 = vmatprep.subr.bf16.mxu0 %v1868_v11 }
 0x515   :  { %1690 = vmatpush3.bf16.msra.mxu1 %v1732_v45 }
 0x516   :  { %1695 = vmatprep.subr.bf16.mxu1 %v1817_v22 }
 0x5ce   :  { %v1121_v53 = vpop.f32.mrf.mxu0  ;;  %v1162_v54 = vpop.f32.mrf.mxu1 }
 0x5cf   :  { %v1169_v43 = vadd.f32 %v1121_v53, %v2004_v13  ;;  %v1168_v4 = vadd.f32 %v2022_v37, %v1162_v54 }
 0x5d0   :  { %v1123_v55 = vpop.f32.mrf.mxu0  ;;  %v1685_v11 = vpop.f32.mrf.mxu1 }
 0x5d1   :  { %v1575_v58 = vmul.f32 -1.442695, %v1169_v43  ;;  %v1176_v0 = vadd.f32 %v1123_v55, %v2007_v17 }
 0x5d2   :  { %v1125_v59 = vpop.f32.mrf.mxu0  ;;  %v1165_v62 = vpop.f32.mrf.mxu1 }
 0x5d3   :  { %1785 = vpow2.f32 %v1575_v58  ;;  %v1576_v2 = vmul.f32 -1.442695, %v1176_v0  ;;  %v181_v58 = vadd.f32 %v2048_v34, %v1973_v50 }
 0x5d4   :  { %v1126_v63 = vpop.f32.mrf.mxu0  ;;  %v1686_v61 = vpop.f32.mrf.mxu1 }
 0x5d5   :  { %1787 = vpow2.f32 %v1576_v2 }
 0x5e0   :  { %v1786_v23 = vpop.eup %1785 }
 0x5e1   :  { %v1173_v31 = vadd.f32 1.0, %v1786_v23 }
 0x5e2   :  { %v1788_v3 = vpop.eup %1787 }
 0x5e3   :  { %1789 = vrcp.f32 %v1173_v31  ;;  %v1180_v39 = vadd.f32 1.0, %v1788_v3 }
 0x5f0   :  { %v1790_v1 = vpop.eup %1789 }
 0x5f1   :  { %v1183_v13 = vmul.f32 %v1790_v1, %v1168_v4 }
 0x5f3   :  { %v1184_v6 = vadd.f32 %v1183_v13, %v1989_v60  ;;  %v1733_v60 = vld [vmem:[%s2189_s3 + $0x20] ss:$12 sps:$4 sm:$0xff]  }
 0x5f5   :  { %1791 = vtanh.f32 %v1184_v6 }
 0x5f6   :  { %1793 = vrcp.f32 %v1180_v39 }
 0x602   :  { %v1792_v7 = vpop.eup %1791 }
 0x603   :  { %v1186_v10 = vsub.f32 %v1036_v9, %v1792_v7  ;;  %v1794_v12 = vpop.eup %1793 }
 0x605   :  { %v1187_v15 = vmul.f32 %v1794_v12, %v1186_v10 }
 0x607   :  { %v1188_v17 = vadd.f32 %v1792_v7, %v1187_v15 }
 0x609   :  { %1577 = vst [vmem:[%s2193_s6 + $0x28] sm:$0xff] %v1188_v17  ;;  %v1195_v16 = vpack.c.bf16 %v1188_v17, %v1188_v17 }
 0x60b   :  { %1584 = vmatmul.mubr.msk.bf16.vlgmr.msra.gmra.mxu0 %vm324_vm2, %v1195_v16  ;;  %1692 = vmatmul.mubr.msk.bf16.vlgmr.msra.gmra.mxu1 %vm324_vm2, %v1195_v16 }
 0x60c   :  { %1404 = vmatpush1.bf16.msra.mxu0 %v1876_v14  ;;  %1423 = vmatprep.mubr.bf16.mxu0 %v1816_v8 }
 0x60d   :  { %1405 = vmatprep.subr.bf16.mxu0 %v1885_v19  ;;  %1699 = vmatprep.mubr.msk.bf16.mxu1 %vm1818_vm3, %v1817_v22 }
 0x60e   :  { %1696 = vmatpush3.bf16.msra.mxu1 %v1733_v60 }
 0x60f   :  { %1697 = vmatprep.subr.bf16.mxu1 %v1817_v22 }
 0x610   :  { %1406 = vmatpush1.bf16.msra.mxu0 %v1890_v20 }
 0x612   :  { %1698 = vmatpush3.bf16.msra.mxu1 %v1734_v18 }
 0x6cb   :  { %v1273_v8 = vpop.f32.mrf.mxu0  ;;  %v1314_v14 = vpop.f32.mrf.mxu1 }
 0x6cc   :  { %v1321_v19 = vadd.f32 %v1273_v8, %v2011_v25  ;;  %v1320_v41 = vadd.f32 %v2022_v37, %v1314_v14 }
 0x6cd   :  { %v1275_v52 = vpop.f32.mrf.mxu0  ;;  %v1693_v21 = vpop.f32.mrf.mxu1 }
 0x6ce   :  { %v1586_v24 = vmul.f32 -1.442695, %v1321_v19  ;;  %v1328_v30 = vadd.f32 %v1275_v52, %v2014_v29 }
 0x6cf   :  { %v1277_v20 = vpop.f32.mrf.mxu0  ;;  %v1317_v26 = vpop.f32.mrf.mxu1 }
 0x6d0   :  { %1795 = vpow2.f32 %v1586_v24  ;;  %v1587_v57 = vmul.f32 -1.442695, %v1328_v30 }
 0x6d1   :  { %v1278_v27 = vpop.f32.mrf.mxu0  ;;  %v1694_v28 = vpop.f32.mrf.mxu1 }
 0x6d2   :  { %1797 = vpow2.f32 %v1587_v57 }
 0x6dd   :  { %v1796_v32 = vpop.eup %1795 }
 0x6de   :  { %v1325_v33 = vadd.f32 1.0, %v1796_v32 }
 0x6df   :  { %v1798_v22 = vpop.eup %1797 }
 0x6e0   :  { %1799 = vrcp.f32 %v1325_v33  ;;  %v1332_v36 = vadd.f32 1.0, %v1798_v22 }
 0x6ed   :  { %v1800_v46 = vpop.eup %1799 }
 0x6ee   :  { %v1335_v25 = vmul.f32 %v1800_v46, %v1320_v41 }
 0x6f0   :  { %v1336_v5 = vadd.f32 %v1335_v25, %v1971_v47 }
 0x6f2   :  { %1801 = vtanh.f32 %v1336_v5 }
 0x6f3   :  { %1803 = vrcp.f32 %v1332_v36 }
 0x6ff   :  { %v1802_v38 = vpop.eup %1801 }
 0x700   :  { %v1338_v40 = vsub.f32 %v1188_v17, %v1802_v38  ;;  %v1804_v42 = vpop.eup %1803 }
 0x702   :  { %v1339_v44 = vmul.f32 %v1804_v42, %v1338_v40 }
 0x704   :  { %v1340_v29 = vadd.f32 %v1802_v38, %v1339_v44 }
 0x706   :  { %1588 = vst [vmem:[%s2193_s6 + $0x30] sm:$0xff] %v1340_v29  ;;  %v1347_v48 = vpack.c.bf16 %v1340_v29, %v1340_v29 }
 0x708   :  { %1595 = vmatmul.mubr.msk.bf16.vlgmr.msra.gmra.mxu0 %vm324_vm2, %v1347_v48  ;;  %1700 = vmatmul.mubr.msk.bf16.vlgmr.msra.gmra.mxu1 %vm324_vm2, %v1347_v48 }
 0x7c8   :  { %v1425_v9 = vpop.f32.mrf.mxu0  ;;  %v1466_v49 = vpop.f32.mrf.mxu1 }
 0x7c9   :  { %v1473_v47 = vadd.f32 %v1425_v9, %v2017_v35  ;;  %v1472_v35 = vadd.f32 %v2022_v37, %v1466_v49 }
 0x7ca   :  { %v1427_v51 = vpop.f32.mrf.mxu0  ;;  %v1701_v45 = vpop.f32.mrf.mxu1 }
 0x7cb   :  { %v1597_v53 = vmul.f32 -1.442695, %v1473_v47  ;;  %v1480_v59 = vadd.f32 %v1427_v51, %v181_v58 }
 0x7cc   :  { %v1429_v54 = vpop.f32.mrf.mxu0  ;;  %v1469_v43 = vpop.f32.mrf.mxu1 }
 0x7cd   :  { %1805 = vpow2.f32 %v1597_v53  ;;  %v1598_v62 = vmul.f32 -1.442695, %v1480_v59 }
 0x7ce   :  { %v1430_v55 = vpop.f32.mrf.mxu0  ;;  %v1702_v11 = vpop.f32.mrf.mxu1 }
 0x7cf   :  { %1807 = vpow2.f32 %v1598_v62 }
 0x7da   :  { %v1806_v63 = vpop.eup %1805 }
 0x7db   :  { %v1477_v61 = vadd.f32 1.0, %v1806_v63 }
 0x7dc   :  { %v1808_v0 = vpop.eup %1807 }
 0x7dd   :  { %1809 = vrcp.f32 %v1477_v61  ;;  %v1484_v3 = vadd.f32 1.0, %v1808_v0 }
 0x7ea   :  { %v1810_v2 = vpop.eup %1809 }
 0x7eb   :  { %v1487_v23 = vmul.f32 %v1810_v2, %v1472_v35 }
 0x7ed   :  { %v1488_v31 = vadd.f32 %v1487_v23, %v1983_v56 }
 0x7ef   :  { %1811 = vtanh.f32 %v1488_v31 }
 0x7f0   :  { %1813 = vrcp.f32 %v1484_v3 }
 0x7fc   :  { %v1812_v4 = vpop.eup %1811 }
 0x7fd   :  { %v1490_v1 = vsub.f32 %v1340_v29, %v1812_v4  ;;  %v1814_v13 = vpop.eup %1813 }
 0x7ff   :  { %v1491_v50 = vmul.f32 %v1814_v13, %v1490_v1 }
 0x801   :  { %v1492_v34 = vadd.f32 %v1812_v4, %v1491_v50 }
 0x803   :  { %1599 = vst [vmem:[%s2193_s6 + $0x38] sm:$0xff] %v1492_v34 }

</bundles_post_ra>
